<compile_context>
chip_gen: v7x
topology: tpu7x:2x2x1
jax: 0.10.0
libtpu: 0.0.40
codegen_flags: <defaults>
</compile_context>

<pallas_src>
import functools

import jax
import jax.numpy as jnp
from jax.experimental import pallas as pl
from jax.experimental.pallas import tpu as pltpu


def _round_up(x: int, m: int) -> int:
    return (x + m - 1) // m * m


def _cdiv(a: int, b: int) -> int:
    return -(-a // b)


def linear_relu_kernel(x_ref, w_ref, b_ref, o_ref, *, precision):
    # Hot path: MXU matmul (f32 accumulate) + VPU bias add + ReLU on
    # VMEM-resident tiles. One store per output tile.
    y = jnp.dot(x_ref[...], w_ref[...],
                preferred_element_type=jnp.float32, precision=precision)
    y = y + b_ref[...]                      # (TM, H) + (1, H) broadcast
    o_ref[...] = jnp.maximum(y, 0.0).astype(o_ref.dtype)


def prepare_linear_params(w_out_in, b, operand_dtype=None):
    """One-time (init-time) parameter preparation, hoisted out of the forward.

    w_out_in: (hidden_dim, state_dim)  -- PyTorch nn.Linear.weight layout.
    b:        (hidden_dim,)
    operand_dtype: e.g. jnp.bfloat16 on v6e/v7x for MXU peak / halved HBM reads.

    Returns (w, b2): w is (state_dim, hidden_dim) in operand_dtype (or original
    dtype), b2 is (1, hidden_dim) float32 (bias add stays f32).
    """
    w = jnp.asarray(w_out_in).T
    if operand_dtype is not None:
        w = w.astype(operand_dtype)
    b2 = jnp.asarray(b, jnp.float32).reshape(1, -1)
    return w, b2


def _vmem_cap_bytes() -> int:
    # Never request the entire physical VMEM (leave room for Mosaic internals).
    try:
        return int(0.75 * pltpu.get_tpu_info().vmem_capacity_bytes)
    except Exception:
        return 48 * 1024 * 1024            # safe on v5e / v6e / v7x


def _choose_tm(B: int, tm_max: int, min_tile: int) -> int:
    if B <= min_tile:
        return B                            # single full-dim block (always legal)
    if B > tm_max:
        return tm_max                       # big, aligned tiles; edge block masked
    if B >= 512:
        # >=2 grid steps so the "parallel" batch axis can shard across v7x's
        # two TensorCores (no-op on v5e/v6e).
        return _round_up(_cdiv(B, 2), min_tile)
    return B                                # whole batch in one full-dim block


def features_extractor_forward(x, w, b2, *, tm_max=1024, precision=None):
    """relu(x @ w + b).

    x:  (B, state_dim)
    w:  (state_dim, hidden_dim)  -- from prepare_linear_params
    b2: (1, hidden_dim) float32  -- from prepare_linear_params
    """
    B, S = x.shape
    S_w, H = w.shape
    assert S_w == S, "weight K-dim must match x feature dim"
    assert b2.shape == (1, H)

    # Cast activations to the operand dtype at the call boundary (halves HBM
    # reads for the bf16 path on v6e/v7x); accumulation stays f32 in-kernel.
    if x.dtype != w.dtype:
        x = x.astype(w.dtype)

    if precision is None and x.dtype == jnp.float32:
        # Keep true-f32 numerics to match the PyTorch f32 reference. Use bf16
        # operands (prepare_linear_params(..., jnp.bfloat16)) for MXU peak.
        precision = jax.lax.Precision.HIGHEST

    op_bytes = x.dtype.itemsize
    min_tile = 16 if op_bytes == 2 else 8   # bf16 min sublane tile is 16
    TM = _choose_tm(B, tm_max, min_tile)
    grid_m = _cdiv(B, TM)

    # VMEM budget: double-buffered x/out tiles + (conservatively counted as
    # double-buffered) resident W and bias, with headroom; capped at ~75% of
    # physical VMEM on the current generation.
    # TODO(synk): add pipeline_mode=pl.Buffered(1) on the grid-invariant W/bias
    # specs and a K-reduction grid axis once large state_dim/hidden_dim make
    # the resident weight a VMEM concern (not needed at these sizes).
    needed = (2 * (TM * S * op_bytes + TM * H * 4)
              + 2 * (S * H * op_bytes + H * 4))
    vmem_limit = min(max(4 * needed, 16 * 1024 * 1024), _vmem_cap_bytes())

    cost = pl.CostEstimate(
        flops=2 * B * S * H,
        bytes_accessed=(B * S + S * H) * op_bytes + (H + B * H) * 4,
        transcendentals=0,
    )

    kernel = functools.partial(linear_relu_kernel, precision=precision)

    return pl.pallas_call(
        kernel,
        out_shape=jax.ShapeDtypeStruct((B, H), jnp.float32),
        grid_spec=pl.GridSpec(
            grid=(grid_m,),
            in_specs=[
                pl.BlockSpec((TM, S), lambda i: (i, 0)),    # x batch tile
                pl.BlockSpec((S, H), lambda i: (0, 0)),     # W, grid-invariant
                pl.BlockSpec((1, H), lambda i: (0, 0)),     # bias, grid-invariant
            ],
            out_specs=pl.BlockSpec((TM, H), lambda i: (i, 0)),
        ),
        compiler_params=pltpu.CompilerParams(
            dimension_semantics=("parallel",),              # no reduction carried
            vmem_limit_bytes=vmem_limit,
        ),
        cost_estimate=cost,
    )(x, w, b2)


if __name__ == "__main__":
    # Small shapes consistent with the module: Linear(state_dim -> hidden_dim).
    batch, state_dim, hidden_dim = 2, 16, 32

    key = jax.random.PRNGKey(0)
    kx, kw, kb = jax.random.split(key, 3)

    # Deterministic synthetic parameters in PyTorch layout: W is (hidden, state).
    bound = 1.0 / (state_dim ** 0.5)
    w_torch = jax.random.uniform(kw, (hidden_dim, state_dim),
                                 minval=-bound, maxval=bound, dtype=jnp.float32)
    b = jax.random.uniform(kb, (hidden_dim,),
                           minval=-bound, maxval=bound, dtype=jnp.float32)
    x = jax.random.normal(kx, (batch, state_dim), dtype=jnp.float32)

    # Params prepared ONCE (transpose + reshape), hoisted out of the per-call path.
    w_f32, b2 = prepare_linear_params(w_torch, b)

    hi = jax.lax.Precision.HIGHEST
    ref = jnp.maximum(jnp.dot(x, w_f32, precision=hi) + b, 0.0)

    out = jax.block_until_ready(features_extractor_forward(x, w_f32, b2))
    assert out.shape == (batch, hidden_dim)
    assert jnp.allclose(out, ref, atol=1e-5, rtol=1e-5)

    # Non-divisible batch with a small tm_max to exercise the multi-tile path
    # (edge block computes on masked-out garbage rows).
    x_big = jax.random.normal(jax.random.fold_in(kx, 1), (67, state_dim),
                              dtype=jnp.float32)
    ref_big = jnp.maximum(jnp.dot(x_big, w_f32, precision=hi) + b, 0.0)
    out_big = jax.block_until_ready(
        features_extractor_forward(x_big, w_f32, b2, tm_max=32))
    assert out_big.shape == (67, hidden_dim)
    assert jnp.allclose(out_big, ref_big, atol=1e-5, rtol=1e-5)

    # Optional bf16 operand path (v6e/v7x MXU peak); f32 accumulation in-kernel.
    w_bf16, b2_bf16 = prepare_linear_params(w_torch, b, operand_dtype=jnp.bfloat16)
    out_bf16 = jax.block_until_ready(features_extractor_forward(x, w_bf16, b2_bf16))
    assert out_bf16.shape == (batch, hidden_dim)
    assert jnp.allclose(out_bf16, ref, atol=5e-2, rtol=5e-2)

    print("KERNEL_OK")
</pallas_src>

<mosaic_0001>
module attributes {stable_mosaic.version = 11 : i64} {
  func.func @linear_relu_kernel(%arg0: i32, %arg1: memref<2x16xf32, #tpu.memory_space<vmem>>, %arg2: memref<16x32xf32, #tpu.memory_space<vmem>>, %arg3: memref<1x32xf32, #tpu.memory_space<vmem>>, %arg4: memref<2x32xf32, #tpu.memory_space<vmem>>) attributes {dimension_semantics = [#tpu.dimension_semantics<parallel>], iteration_bounds = array<i64: 1>, scalar_prefetch = 0 : i64, scratch_operands = 0 : i64, tpu.core_type = #tpu.core_type<tc>, window_params = [{transform_indices = @transform_0, window_bounds = array<i64: 2, 16>}, {pipeline_mode = #tpu.pipeline_mode<synchronous>, transform_indices = @transform_1, window_bounds = array<i64: 16, 32>}, {pipeline_mode = #tpu.pipeline_mode<synchronous>, transform_indices = @transform_2, window_bounds = array<i64: 1, 32>}, {transform_indices = @transform_3, window_bounds = array<i64: 2, 32>}]} {
    %c0 = arith.constant 0 : index
    %c0_0 = arith.constant 0 : index
    %0 = vector.load %arg1[%c0, %c0_0] : memref<2x16xf32, #tpu.memory_space<vmem>>, vector<2x16xf32>
    %c0_1 = arith.constant 0 : index
    %c0_2 = arith.constant 0 : index
    %1 = vector.load %arg2[%c0_1, %c0_2] : memref<16x32xf32, #tpu.memory_space<vmem>>, vector<16x32xf32>
    %cst = arith.constant dense<0.000000e+00> : vector<2x32xf32>
    %2 = tpu.matmul %0, %1, %cst {dimension_numbers = #tpu.dot_dimension_numbers<[1], [0], [0], [1], [0, 0, 1, 1], [], []>, precision = #tpu.contract_precision<fp32>} : vector<2x16xf32>, vector<16x32xf32>, vector<2x32xf32> -> vector<2x32xf32>
    %c0_3 = arith.constant 0 : index
    %c0_4 = arith.constant 0 : index
    %3 = vector.load %arg3[%c0_3, %c0_4] : memref<1x32xf32, #tpu.memory_space<vmem>>, vector<1x32xf32>
    %4 = vector.broadcast %3 : vector<1x32xf32> to vector<2x32xf32>
    %5 = arith.addf %2, %4 : vector<2x32xf32>
    %cst_5 = arith.constant 0.000000e+00 : f32
    %6 = vector.broadcast %cst_5 : f32 to vector<2x32xf32>
    %7 = arith.maximumf %5, %6 : vector<2x32xf32>
    %c0_6 = arith.constant 0 : index
    %c0_7 = arith.constant 0 : index
    %8 = vector.load %arg4[%c0_6, %c0_7] : memref<2x32xf32, #tpu.memory_space<vmem>>, vector<2x32xf32>
    tpu.vector_store %arg4[%c0_6, %c0_7], %7 {strides = array<i32>} : memref<2x32xf32, #tpu.memory_space<vmem>>, vector<2x32xf32>,
    return
  }
  func.func @transform_0(%arg0: i32) -> (i32, i32) {
    %c0_i32 = arith.constant 0 : i32
    %c0_i32_0 = arith.constant 0 : i32
    return %arg0, %c0_i32 : i32, i32
  }
  func.func @transform_1(%arg0: i32) -> (i32, i32) {
    %c0_i32 = arith.constant 0 : i32
    %c0_i32_0 = arith.constant 0 : i32
    %c0_i32_1 = arith.constant 0 : i32
    return %c0_i32, %c0_i32_0 : i32, i32
  }
  func.func @transform_2(%arg0: i32) -> (i32, i32) {
    %c0_i32 = arith.constant 0 : i32
    %c0_i32_0 = arith.constant 0 : i32
    %c0_i32_1 = arith.constant 0 : i32
    return %c0_i32, %c0_i32_0 : i32, i32
  }
  func.func @transform_3(%arg0: i32) -> (i32, i32) {
    %c0_i32 = arith.constant 0 : i32
    %c0_i32_0 = arith.constant 0 : i32
    return %arg0, %c0_i32 : i32, i32
  }
}

</mosaic_0001>

<bundles_post_ra>
// kernel: tpu_custom_call.1
= control target key start
LH: loop header
LB: loop body
LE: loop exit
PB: predicated region body
PF: predicated region fallthrough
CT: control target
= control target key end

     0   :  { %8 = vsyncpa [#allocation3], 0  ;;  %s782_s0 = inlined_call_operand.hbm [shape: f32[2,16], index: 0, kind: input, shape index: {}]   ;;  %s783_s1 = inlined_call_operand.hbm [shape: f32[16,32], index: 1, kind: input, shape index: {}]   ;;  %s784_s2 = inlined_call_operand.vmem [shape: f32[1,32], index: 2, kind: input, shape index: {}]   ;;  %s785_s3 = inlined_call_operand.hbm [shape: f32[2,32], index: 3, kind: output, shape index: {}]  }
   0x1   :  { %9 = vsyncpa [#allocation6], 0 }
   0x2   :  { %10 = vsyncpa [#allocation4], 0  ;;  %s702_s12 = smov [#allocation2]   ;;  %s703_s14 = smov [#allocation5]  }
   0x3   :  { %s17_s13 = sshll.u32 %s702_s12, 4  ;;  %s26_s15 = sshll.u32 %s703_s14, 4  ;;  %s18_s13 = int_to_ptr.vmem [resolvable:$true] %s17_s13  ;;  %s730_s15 = int_to_ptr.vmem [resolvable:$true] %s26_s15 }
   0x4   :  { %s630_s18 = scalar_lea.hbm %s782_s0, 32 }
   0x5   :  { %p631_p0 = scmp.ne.s32.totalorder %s782_s0, %s630_s18  ;;  %p634_p1 = scmp.lt.u32.totalorder %s630_s18, %s782_s0 }
   0x7   :  { %p636_p2 = pnand %p634_p1, %p631_p0 }
   0x9   :  { %639 = shalt.err (!%p636_p2)
}
   0xa   :  { %s640_s23 = scalar_lea.vmem %s18_s13, 32  ;;  %p645_p4 = scmp.lt.s32.totalorder %s18_s13, %s18_s13 }
   0xb   :  { %p641_p3 = scmp.ne.s32.totalorder %s18_s13, %s640_s23  ;;  %p646_p5 = scmp.lt.s32.totalorder %s640_s23, %s640_s23 }
   0xd   :  { %p647_p6 = por %p646_p5, %p645_p4 }
   0xf   :  { %p648_p7 = pnand %p647_p6, %p641_p3 }
  0x11   :  { %651 = shalt.err (!%p648_p7)
}
  0x12   :  { %20 = dma.hbm_to_vmem [thread:$0]  %s782_s0, 32, %s18_s13, [#allocation3]  }
  0x13   :  { %s652_s28 = scalar_lea.hbm %s783_s1, 256 }
  0x14   :  { %p653_p8 = scmp.ne.s32.totalorder %s783_s1, %s652_s28  ;;  %p656_p9 = scmp.lt.u32.totalorder %s652_s28, %s783_s1 }
  0x16   :  { %p658_p10 = pnand %p656_p9, %p653_p8 }
  0x18   :  { %661 = shalt.err (!%p658_p10)
}
  0x19   :  { %s662_s6 = scalar_lea.vmem %s730_s15, 256  ;;  %p667_p12 = scmp.lt.s32.totalorder %s730_s15, %s730_s15 }
  0x1a   :  { %p663_p11 = scmp.ne.s32.totalorder %s730_s15, %s662_s6  ;;  %p668_p13 = scmp.lt.s32.totalorder %s662_s6, %s662_s6 }
  0x1c   :  { %p669_p0 = por %p668_p13, %p667_p12 }
  0x1e   :  { %p670_p1 = pnand %p669_p0, %p663_p11 }
  0x20   :  { %673 = shalt.err (!%p670_p1)
}
  0x21   :  { %s704_s0 = smov 128   ;;  %s705_s7 = smov 8  }
  0x22   :  { %32 = dma.hbm_to_vmem [thread:$0]  %s783_s1, 256, %s730_s15, [#allocation6], %s704_s0, %s704_s0, %s705_s7  }
  0x23   :  { %696 = dma.done.wait [#allocation3], 32  }
  0x24   :  { %697 = vsyncadd [#allocation3], 4294967264 }
  0x25   :  { %698 = dma.done.wait [#allocation6], 256  }
  0x26   :  { %699 = vsyncadd [#allocation6], 4294967040  ;;  %v706_v0 = vmov 0.0|0.0   ;;  %vm707_vm0 = vmmov 0   ;;  %v708_v1 = vmov 0.0   ;;  %vm51_vm1 = vcmask 130048  }
  0x27   :  { %603 = vmatprep.subr.bf16.mxu0 %v706_v0  ;;  %577 = vmatprep.mubr.msk.f32.mxu0 %vm707_vm0, %v708_v1  ;;  %v42_v2 = vld [vmem:[#allocation5] sm:$0xff]  ;;  %v43_v3 = vld [vmem:[#allocation5 + $0x8] sm:$0xff]  ;;  %v41_v4 = vld [vmem:[#allocation2] sm:$0x3]  ;;  %s709_s11 = smov [#allocation7]   ;;  %vm515_vm2 = vcmask 254976  }
  0x28   :  { %594 = vmatprep.subr.bf16.mxu1 %v706_v0  ;;  %556 = vmatprep.mubr.msk.f32.mxu1 %vm707_vm0, %v708_v1  ;;  %v56_v5 = vand.u32 4294901760, %v42_v2  ;;  %v59_v6 = vand.u32 4294901760, %v43_v3  ;;  %v53_v7 = vsel %vm51_vm1, %v41_v4, 0  ;;  %v533_v27 = vld [vmem:[%s784_s2] ss:$0 sm:$0xff]  ;;  %s523_s12 = sshll.u32 %s709_s11, 4  ;;  %s524_s12 = int_to_ptr.vmem [resolvable:$true] %s523_s12 }
  0x29   :  { %v122_v8 = vand.u32 4294901760, %v53_v7  ;;  %s674_s13 = scalar_lea.vmem %s524_s12, 32  ;;  %p679_p3 = scmp.lt.s32.totalorder %s524_s12, %s524_s12 }
  0x2a   :  { %v595_v9 = vpack.c.bf16 %v59_v6, %v56_v5  ;;  %v134_v10 = vsub.f32 %v42_v2, %v56_v5  ;;  %v141_v11 = vsub.f32 %v43_v3, %v59_v6  ;;  %p675_p2 = scmp.ne.s32.totalorder %s524_s12, %s674_s13  ;;  %p680_p4 = scmp.lt.s32.totalorder %s674_s13, %s674_s13 }
  0x2b   :  { %v123_v12 = vsub.f32 %v53_v7, %v122_v8 }
  0x2c   :  { %605 = vmatpush3.bf16.msra.mxu0 %v595_v9  ;;  %596 = vmatpush3.bf16.msra.mxu1 %v595_v9  ;;  %v135_v13 = vand.u32 4294901760, %v134_v10  ;;  %v142_v14 = vand.u32 4294901760, %v141_v11  ;;  %v601_v24 = vpack.c.bf16 %v141_v11, %v134_v10  ;;  %p681_p5 = por %p680_p4, %p679_p3 }
  0x2d   :  { %v124_v15 = vand.u32 4294901760, %v123_v12  ;;  %597 = vmatprep.subr.bf16.mxu1 %v706_v0  ;;  %606 = vmatprep.subr.bf16.mxu0 %v706_v0 }
  0x2e   :  { %v136_v16 = vsub.f32 %v134_v10, %v135_v13  ;;  %v143_v17 = vsub.f32 %v141_v11, %v142_v14  ;;  %v607_v18 = vpack.c.bf16 %v142_v14, %v135_v13  ;;  %p682_p6 = pnand %p681_p5, %p675_p2 }
  0x2f   :  { %578 = vmatmul.mubr.f32.vlgmr.msra.gmra.mrb[0].mxu0 %v124_v15  ;;  %v125_v19 = vsub.f32 %v123_v12, %v124_v15 }
  0x30   :  { %v137_v20 = vand.u32 4294901760, %v136_v16  ;;  %v144_v21 = vand.u32 4294901760, %v143_v17  ;;  %608 = vmatpush3.bf16.msra.mxu0 %v607_v18  ;;  %584 = vmatprep.mubr.msk.f32.mxu0 %vm707_vm0, %v708_v1 }
  0x31   :  { %v126_v22 = vand.u32 4294901760, %v125_v19  ;;  %609 = vmatprep.subr.bf16.mxu0 %v706_v0 }
  0x32   :  { %v598_v23 = vpack.c.bf16 %v144_v21, %v137_v20 }
  0x33   :  { %557 = vmatmul.mubr.f32.vlgmr.msra.gmra.mrb[0].mxu1 %v126_v22 }
  0x34   :  { %599 = vmatpush3.bf16.msra.mxu1 %v598_v23  ;;  %563 = vmatprep.mubr.msk.f32.mxu1 %vm707_vm0, %v708_v1 }
  0x35   :  { %600 = vmatprep.subr.bf16.mxu1 %v706_v0 }
  0x37   :  { %585 = vmatmul.mubr.f32.vlgmr.msra.gmra.mrb[0].mxu0 %v122_v8 }
  0x38   :  { %611 = vmatpush3.bf16.msra.mxu0 %v595_v9  ;;  %591 = vmatprep.mubr.msk.f32.mxu0 %vm707_vm0, %v708_v1 }
  0x3b   :  { %564 = vmatmul.mubr.f32.vlgmr.msra.gmra.mrb[0].mxu1 %v122_v8 }
  0x3c   :  { %602 = vmatpush3.bf16.msra.mxu1 %v601_v24  ;;  %570 = vmatprep.mubr.msk.f32.mxu1 %vm707_vm0, %v708_v1 }
  0x3f   :  { %592 = vmatmul.mubr.f32.vlgmr.msra.gmra.mrb[0].mxu0 %v122_v8 }
  0x43   :  { %571 = vmatmul.mubr.f32.vlgmr.msra.gmra.mrb[0].mxu1 %v123_v12 }
 0x112   :  { %v510_v25 = vpop.f32.mrb[0].mxu0 }
 0x113   :  { %v593_v26 = vpop.f32.mrb[1].mxu0 }
 0x116   :  { %v285_v28 = vpop.f32.mrb[0].mxu1 }
 0x117   :  { %v612_v29 = vadd.f32 %v533_v27, %v285_v28  ;;  %v572_v30 = vpop.f32.mrb[1].mxu1 }
 0x119   :  { %v613_v31 = vadd.f32 %v612_v29, %v510_v25 }
 0x11b   :  { %v514_v32 = vmax.f32 %v613_v31, 0.0 }
 0x11d   :  { %516 = vst.msk [vmem:[#allocation7] sm:$0x3] %vm515_vm2, %v514_v32 }
 0x11e   :  { %685 = shalt.err (!%p682_p6)
}
 0x11f   :  { %s686_s2 = scalar_lea.hbm %s785_s3, 32 }
 0x120   :  { %p687_p7 = scmp.ne.s32.totalorder %s785_s3, %s686_s2  ;;  %p690_p8 = scmp.lt.u32.totalorder %s686_s2, %s785_s3 }
 0x122   :  { %p692_p9 = pnand %p690_p8, %p687_p7 }
 0x124   :  { %695 = shalt.err (!%p692_p9)
}
 0x125   :  { %526 = dma.vmem_to_hbm [thread:$0]  %s524_s12, 32, %s785_s3, [#allocation4]  }
 0x126   :  { %700 = dma.done.wait [#allocation4], 32  }
 0x127   :  { %701 = vsyncadd [#allocation4], 4294967264 }
 0x128   :  { %530 = vsyncpa [#allocation3], 1 }
 0x129   :  { %531 = vsyncpa [#allocation6], 1 }
 0x12a   :  { %532 = vsyncpa [#allocation4], 1 }

</bundles_post_ra>
